<compile_context>
chip_gen: v5e
topology: v5e:2x2
jax: 0.10.0
libtpu: 0.0.40
codegen_flags: <defaults>
</compile_context>

<pallas_src>
import jax
import jax.numpy as jnp
from jax import lax
from jax.experimental import pallas as pl
from jax.experimental.pallas import tpu as pltpu


def value_mlp_kernel(x_ref, w1_ref, b1_ref, w2_ref, b2_ref, w3_ref, b3_ref,
                     o_ref):
    # Layer 1: (TB, S) @ (S, 128) on the MXU, f32 accumulation.
    x = x_ref[...].astype(w1_ref.dtype)
    h1 = jnp.dot(x, w1_ref[...], preferred_element_type=jnp.float32) + b1_ref[...]
    h1 = jnp.maximum(h1, 0.0)

    # Layer 2: (TB, 128) @ (128, 64) on the MXU, f32 accumulation.
    h2 = jnp.dot(h1.astype(w2_ref.dtype), w2_ref[...],
                 preferred_element_type=jnp.float32) + b2_ref[...]
    h2 = jnp.maximum(h2, 0.0)

    # Layer 3: contract the 64-wide feature dim of h2 against the (1, 64)
    # weight row -> LANE-DENSE (1, TB) output (no lane-width-1 masked stores).
    out_row = lax.dot_general(
        w3_ref[...], h2,
        dimension_numbers=(((1,), (1,)), ((), ())),
        preferred_element_type=jnp.float32) + b3_ref[...]
    o_ref[...] = out_row.astype(o_ref.dtype)


def _round_up(x, m):
    return ((x + m - 1) // m) * m


def value_model_forward(states, params, *, tile_b=4096, dot_dtype=jnp.bfloat16):
    """states: (B, state_dim) float32. Returns (B, 1) float32."""
    w1, b1, w2, b2, w3_row, b3 = params
    B, state_dim = states.shape

    # MXU operand precision: cast resident weights ONCE here (not per tile).
    w1_c = w1.astype(dot_dtype)
    w2_c = w2.astype(dot_dtype)

    # ---- Batch tile selection ------------------------------------------------
    b8 = _round_up(B, 8)
    tb = _round_up(max(8, min(int(tile_b), 8192)), 8)   # multiple of 8, <= 8192
    if tb >= b8:
        tb = b8                              # single tile covers padded batch
    else:
        tb = _round_up(tb, 128)              # multi-tile: lane-dense out block
        if tb >= b8:                         # needs tb % 128 == 0
            tb = b8
    # Prefer >=2 grid steps for large batches so the "parallel" axis can shard
    # across v7x's two TensorCores.
    if tb == b8 and b8 >= 2048:
        tb = _round_up(pl.cdiv(b8, 2), 128)

    b_pad = _round_up(B, tb)
    if b_pad != B:
        # Zero-pad the ragged tail; padded rows are computed and sliced away.
        states = jnp.pad(states, ((0, b_pad - B), (0, 0)))
    grid = (b_pad // tb,)

    # ---- VMEM budget (explicit so large tiles work on v5e's 16 MiB default) --
    lane = 128
    dot_bytes = jnp.dtype(dot_dtype).itemsize
    s_pad = _round_up(state_dim, lane)
    vmem_est = (
        2 * tb * s_pad * 4                    # double-buffered states tiles (f32)
        + tb * s_pad * dot_bytes              # in-kernel cast of x for layer 1
        + tb * lane * (4 + dot_bytes)         # h1 (f32) + its cast for layer 2
        + tb * lane * 4                       # h2 (f32; 64 lanes padded)
        + 2 * 8 * _round_up(tb, lane) * 4     # double-buffered (1, tb) output
        + (2 << 20)                           # resident weights/biases + slack
    )
    vmem_limit = int(min(max(vmem_est, 16 << 20), 48 << 20))

    const = lambda arr: pl.BlockSpec(arr.shape, lambda i: (0,) * arr.ndim)

    out_row = pl.pallas_call(
        value_mlp_kernel,
        out_shape=jax.ShapeDtypeStruct((1, b_pad), jnp.float32),
        grid=grid,
        in_specs=[
            pl.BlockSpec((tb, state_dim), lambda i: (i, 0)),   # states tile
            const(w1_c), const(b1),                            # resident weights
            const(w2_c), const(b2),
            const(w3_row), const(b3),
        ],
        out_specs=pl.BlockSpec((1, tb), lambda i: (0, i)),     # lane-dense out
        compiler_params=pltpu.CompilerParams(
            dimension_semantics=("parallel",),                 # megacore on v7x
            vmem_limit_bytes=vmem_limit,
        ),
    )(states, w1_c, b1, w2_c, b2, w3_row, b3)

    return out_row[0, :B][:, None]


def init_params(key, state_dim):
    """Deterministic synthetic init matching the PyTorch layer shapes.

    PyTorch Linear stores W as (out, in); we store the transpose (in, out) so
    the kernel computes x @ W directly. w3 is stored as a (1, 64) row for the
    lane-dense final layer; biases are 2D (1, out) for clean TPU broadcasting.
    """
    k1, k2, k3, k4, k5, k6 = jax.random.split(key, 6)

    def uniform(k, shape, fan_in):
        bound = 1.0 / jnp.sqrt(fan_in)
        return jax.random.uniform(k, shape, jnp.float32, -bound, bound)

    w1 = uniform(k1, (state_dim, 128), state_dim)
    b1 = uniform(k2, (1, 128), state_dim)
    w2 = uniform(k3, (128, 64), 128)
    b2 = uniform(k4, (1, 64), 128)
    w3_row = uniform(k5, (1, 64), 64)   # row form of the (64, 1) weight
    b3 = uniform(k6, (1, 1), 64)
    return (w1, b1, w2, b2, w3_row, b3)


def reference_forward(states, params):
    w1, b1, w2, b2, w3_row, b3 = params
    h1 = jnp.maximum(states @ w1 + b1, 0.0)
    h2 = jnp.maximum(h1 @ w2 + b2, 0.0)
    return h2 @ w3_row.T + b3


if __name__ == "__main__":
    key = jax.random.PRNGKey(0)
    k_params, k_states = jax.random.split(key)

    state_dim = 32
    params = init_params(k_params, state_dim)

    # 1) Small batch, default bf16 MXU operands (f32 accumulation) -> loose tol.
    batch = 8
    states = jax.random.normal(k_states, (batch, state_dim), dtype=jnp.float32)
    out = jax.block_until_ready(value_model_forward(states, params))
    ref = reference_forward(states, params)
    assert out.shape == (batch, 1)
    assert jnp.allclose(out, ref, atol=5e-2, rtol=5e-2)

    # 2) Ragged batch, exact f32 path -> tight tolerance (exercises padding).
    batch2 = 13
    states2 = jax.random.normal(jax.random.PRNGKey(1), (batch2, state_dim),
                                dtype=jnp.float32)
    out2 = jax.block_until_ready(
        value_model_forward(states2, params, dot_dtype=jnp.float32))
    ref2 = reference_forward(states2, params)
    assert out2.shape == (batch2, 1)
    assert jnp.allclose(out2, ref2, atol=1e-5, rtol=1e-5)

    # 3) Multi-tile grid (tile_b=128 -> 2 grid steps, lane-dense tiled output).
    batch3 = 200
    states3 = jax.random.normal(jax.random.PRNGKey(2), (batch3, state_dim),
                                dtype=jnp.float32)
    out3 = jax.block_until_ready(
        value_model_forward(states3, params, tile_b=128, dot_dtype=jnp.float32))
    ref3 = reference_forward(states3, params)
    assert out3.shape == (batch3, 1)
    assert jnp.allclose(out3, ref3, atol=1e-5, rtol=1e-5)

    # TODO(synk): the PyTorch `detach` flag is an autograd concept (no effect on
    # forward math) and is intentionally not modeled.  Real deployment should
    # import trained PyTorch (out,in) weights transposed to (in,out); if the
    # upstream producer can emit bf16 states, accept them directly to halve the
    # HBM states stream (a wrapper-side cast alone would net ~zero).

    print("KERNEL_OK")
</pallas_src>

<mosaic_0001>
module attributes {stable_mosaic.version = 11 : i64} {
  func.func @value_mlp_kernel(%arg0: i32, %arg1: memref<8x32xf32, #tpu.memory_space<vmem>>, %arg2: memref<32x128xbf16, #tpu.memory_space<vmem>>, %arg3: memref<1x128xf32, #tpu.memory_space<vmem>>, %arg4: memref<128x64xbf16, #tpu.memory_space<vmem>>, %arg5: memref<1x64xf32, #tpu.memory_space<vmem>>, %arg6: memref<1x64xf32, #tpu.memory_space<vmem>>, %arg7: memref<1x1xf32, #tpu.memory_space<vmem>>, %arg8: memref<1x8xf32, #tpu.memory_space<vmem>>) attributes {dimension_semantics = [#tpu.dimension_semantics<parallel>], iteration_bounds = array<i64: 1>, scalar_prefetch = 0 : i64, scratch_operands = 0 : i64, tpu.core_type = #tpu.core_type<tc>, window_params = [{transform_indices = @transform_0, window_bounds = array<i64: 8, 32>}, {pipeline_mode = #tpu.pipeline_mode<synchronous>, transform_indices = @transform_1, window_bounds = array<i64: 32, 128>}, {pipeline_mode = #tpu.pipeline_mode<synchronous>, transform_indices = @transform_2, window_bounds = array<i64: 1, 128>}, {pipeline_mode = #tpu.pipeline_mode<synchronous>, transform_indices = @transform_3, window_bounds = array<i64: 128, 64>}, {pipeline_mode = #tpu.pipeline_mode<synchronous>, transform_indices = @transform_4, window_bounds = array<i64: 1, 64>}, {pipeline_mode = #tpu.pipeline_mode<synchronous>, transform_indices = @transform_5, window_bounds = array<i64: 1, 64>}, {pipeline_mode = #tpu.pipeline_mode<synchronous>, transform_indices = @transform_6, window_bounds = array<i64: 1, 1>}, {transform_indices = @transform_7, window_bounds = array<i64: 1, 8>}]} {
    %c0 = arith.constant 0 : index
    %c0_0 = arith.constant 0 : index
    %0 = vector.load %arg1[%c0, %c0_0] : memref<8x32xf32, #tpu.memory_space<vmem>>, vector<8x32xf32>
    %1 = arith.truncf %0 : vector<8x32xf32> to vector<8x32xbf16>
    %c0_1 = arith.constant 0 : index
    %c0_2 = arith.constant 0 : index
    %2 = vector.load %arg2[%c0_1, %c0_2] : memref<32x128xbf16, #tpu.memory_space<vmem>>, vector<32x128xbf16>
    %cst = arith.constant dense<0.000000e+00> : vector<8x128xf32>
    %3 = tpu.matmul %1, %2, %cst {dimension_numbers = #tpu.dot_dimension_numbers<[1], [0], [0], [1], [0, 0, 1, 1], [], []>} : vector<8x32xbf16>, vector<32x128xbf16>, vector<8x128xf32> -> vector<8x128xf32>
    %c0_3 = arith.constant 0 : index
    %c0_4 = arith.constant 0 : index
    %4 = vector.load %arg3[%c0_3, %c0_4] : memref<1x128xf32, #tpu.memory_space<vmem>>, vector<1x128xf32>
    %5 = vector.broadcast %4 : vector<1x128xf32> to vector<8x128xf32>
    %6 = arith.addf %3, %5 : vector<8x128xf32>
    %cst_5 = arith.constant 0.000000e+00 : f32
    %7 = vector.broadcast %cst_5 : f32 to vector<8x128xf32>
    %8 = arith.maximumf %6, %7 : vector<8x128xf32>
    %9 = arith.truncf %8 : vector<8x128xf32> to vector<8x128xbf16>
    %c0_6 = arith.constant 0 : index
    %c0_7 = arith.constant 0 : index
    %10 = vector.load %arg4[%c0_6, %c0_7] : memref<128x64xbf16, #tpu.memory_space<vmem>>, vector<128x64xbf16>
    %cst_8 = arith.constant dense<0.000000e+00> : vector<8x64xf32>
    %11 = tpu.matmul %9, %10, %cst_8 {dimension_numbers = #tpu.dot_dimension_numbers<[1], [0], [0], [1], [0, 0, 1, 1], [], []>} : vector<8x128xbf16>, vector<128x64xbf16>, vector<8x64xf32> -> vector<8x64xf32>
    %c0_9 = arith.constant 0 : index
    %c0_10 = arith.constant 0 : index
    %12 = vector.load %arg5[%c0_9, %c0_10] : memref<1x64xf32, #tpu.memory_space<vmem>>, vector<1x64xf32>
    %13 = vector.broadcast %12 : vector<1x64xf32> to vector<8x64xf32>
    %14 = arith.addf %11, %13 : vector<8x64xf32>
    %cst_11 = arith.constant 0.000000e+00 : f32
    %15 = vector.broadcast %cst_11 : f32 to vector<8x64xf32>
    %16 = arith.maximumf %14, %15 : vector<8x64xf32>
    %c0_12 = arith.constant 0 : index
    %c0_13 = arith.constant 0 : index
    %17 = vector.load %arg6[%c0_12, %c0_13] : memref<1x64xf32, #tpu.memory_space<vmem>>, vector<1x64xf32>
    %cst_14 = arith.constant dense<0.000000e+00> : vector<1x8xf32>
    %18 = tpu.matmul %17, %16, %cst_14 {dimension_numbers = #tpu.dot_dimension_numbers<[1], [1], [0], [0], [0, 0, 1, 0], [], []>} : vector<1x64xf32>, vector<8x64xf32>, vector<1x8xf32> -> vector<1x8xf32>
    %c0_15 = arith.constant 0 : index
    %c0_16 = arith.constant 0 : index
    %19 = vector.load %arg7[%c0_15, %c0_16] : memref<1x1xf32, #tpu.memory_space<vmem>>, vector<1x1xf32>
    %20 = vector.broadcast %19 : vector<1x1xf32> to vector<1x8xf32>
    %21 = arith.addf %18, %20 : vector<1x8xf32>
    %c0_17 = arith.constant 0 : index
    %c0_18 = arith.constant 0 : index
    %22 = vector.load %arg8[%c0_17, %c0_18] : memref<1x8xf32, #tpu.memory_space<vmem>>, vector<1x8xf32>
    tpu.vector_store %arg8[%c0_17, %c0_18], %21 {strides = array<i32>} : memref<1x8xf32, #tpu.memory_space<vmem>>, vector<1x8xf32>,
    return
  }
  func.func @transform_0(%arg0: i32) -> (i32, i32) {
    %c0_i32 = arith.constant 0 : i32
    %c0_i32_0 = arith.constant 0 : i32
    return %arg0, %c0_i32 : i32, i32
  }
  func.func @transform_1(%arg0: i32) -> (i32, i32) {
    %c0_i32 = arith.constant 0 : i32
    %c0_i32_0 = arith.constant 0 : i32
    %c0_i32_1 = arith.constant 0 : i32
    return %c0_i32, %c0_i32_0 : i32, i32
  }
  func.func @transform_2(%arg0: i32) -> (i32, i32) {
    %c0_i32 = arith.constant 0 : i32
    %c0_i32_0 = arith.constant 0 : i32
    %c0_i32_1 = arith.constant 0 : i32
    return %c0_i32, %c0_i32_0 : i32, i32
  }
  func.func @transform_3(%arg0: i32) -> (i32, i32) {
    %c0_i32 = arith.constant 0 : i32
    %c0_i32_0 = arith.constant 0 : i32
    %c0_i32_1 = arith.constant 0 : i32
    return %c0_i32, %c0_i32_0 : i32, i32
  }
  func.func @transform_4(%arg0: i32) -> (i32, i32) {
    %c0_i32 = arith.constant 0 : i32
    %c0_i32_0 = arith.constant 0 : i32
    %c0_i32_1 = arith.constant 0 : i32
    return %c0_i32, %c0_i32_0 : i32, i32
  }
  func.func @transform_5(%arg0: i32) -> (i32, i32) {
    %c0_i32 = arith.constant 0 : i32
    %c0_i32_0 = arith.constant 0 : i32
    %c0_i32_1 = arith.constant 0 : i32
    return %c0_i32, %c0_i32_0 : i32, i32
  }
  func.func @transform_6(%arg0: i32) -> (i32, i32) {
    %c0_i32 = arith.constant 0 : i32
    %c0_i32_0 = arith.constant 0 : i32
    %c0_i32_1 = arith.constant 0 : i32
    return %c0_i32, %c0_i32_0 : i32, i32
  }
  func.func @transform_7(%arg0: i32) -> (i32, i32) {
    %c0_i32 = arith.constant 0 : i32
    %c0_i32_0 = arith.constant 0 : i32
    return %c0_i32, %arg0 : i32, i32
  }
}

</mosaic_0001>

<bundles_post_ra>
// kernel: tpu_custom_call.1
= control target key start
LH: loop header
LB: loop body
LE: loop exit
PB: predicated region body
PF: predicated region fallthrough
CT: control target
= control target key end

     0   :  { %s380_s0 = inlined_call_operand.vmem [shape: f32[8,32], index: 0, kind: input, shape index: {}]   ;;  %s381_s1 = inlined_call_operand.vmem [shape: bf16[32,128], index: 1, kind: input, shape index: {}]   ;;  %s382_s2 = inlined_call_operand.vmem [shape: f32[1,128], index: 2, kind: input, shape index: {}]   ;;  %s383_s3 = inlined_call_operand.vmem [shape: bf16[128,64], index: 3, kind: input, shape index: {}]   ;;  %s384_s4 = inlined_call_operand.vmem [shape: f32[1,64], index: 4, kind: input, shape index: {}]   ;;  %s385_s5 = inlined_call_operand.vmem [shape: f32[1,64], index: 5, kind: input, shape index: {}]   ;;  %s386_s6 = inlined_call_operand.<no memory space> [shape: f32[1,1], index: 6, kind: input, shape index: {}]   ;;  %s387_s7 = inlined_call_operand.hbm [shape: f32[1,8], index: 7, kind: output, shape index: {}]  }
   0x1   :  { %v12_v0 = vstv %s386_s6 }
   0x2   :  { %13 = vst [vmem:[#allocation2] sm:$0x1] %v12_v0 }
   0x3   :  { %v250_v1 = vld [vmem:[%s381_s1 + $0x8] sm:$0xff]  ;;  %v258_v2 = vld [vmem:[%s383_s3 + $0x38] sm:$0xff]  ;;  %v249_v3 = vld [vmem:[%s381_s1] sm:$0xff] }
   0x4   :  { %62 = vmatpush.bf16.msra.mxu0 %v250_v1  ;;  %v30_v4 = vld [vmem:[%s380_s0] sm:$0xff]  ;;  %139 = vmatpush.bf16.msra.mxu1 %v258_v2  ;;  %v257_v5 = vld [vmem:[%s383_s3 + $0x30] sm:$0xff] }
   0x5   :  { %14 = vsyncpa [#allocation4], 0  ;;  %v31_v6 = vpack.c.bf16 %v30_v4, %v30_v4  ;;  %vm52_vm0 = vcmask 261120   ;;  %v256_v7 = vld [vmem:[%s383_s3 + $0x28] sm:$0xff]  ;;  %v255_v8 = vld [vmem:[%s383_s3 + $0x20] sm:$0xff]  ;;  %v290_v20 = vmov 0  }
   0x6   :  { %v254_v9 = vld [vmem:[%s383_s3 + $0x18] sm:$0xff]  ;;  %v253_v10 = vld [vmem:[%s383_s3 + $0x10] sm:$0xff]  ;;  %v252_v11 = vld [vmem:[%s383_s3 + $0x8] sm:$0xff]  ;;  %261 = vset.pattern.permute.xlu0 %v290_v20  ;;  %vm161_vm1 = vcmask 523264   ;;  %s291_s26 = smov [#allocation3]   ;;  %s197_s30 = sshll.u32 %s387_s7, 4  ;;  %s198_s30 = int_to_ptr.hbm [resolvable:$true] %s197_s30 }
   0x7   :  { %v251_v12 = vld [vmem:[%s383_s3] sm:$0xff]  ;;  %s195_s27 = sshll.u32 %s291_s26, 4  ;;  %vm188_vm2 = vcmask 57344   ;;  %s196_s27 = int_to_ptr.vmem [resolvable:$true] %s195_s27 }
   0x8   :  { %63 = vmatpush.bf16.msra.mxu0 %v249_v3  ;;  %140 = vmatpush.bf16.msra.mxu1 %v257_v5  ;;  %v262_v13 = vld [vmem:[%s382_s2] ss:$0 sm:$0xff] }
   0x9   :  { %v154_v19 = vld [vmem:[#allocation2] sm:$0x1] }
   0xa   :  { %157 = vperm.xlu0 %261, %v154_v19   ;;  %v263_v21 = vld [vmem:[%s384_s4] ss:$0 sm:$0xff] }
   0xb   :  { %214 = vmatmul.msk.bf16.vlgmr.msra.gmra.mxu0 %vm52_vm0, %v31_v6  ;;  %v153_v25 = vld [vmem:[%s385_s5] sm:$0x1] }
   0xc   :  { %141 = vmatpush.bf16.msra.mxu1 %v256_v7 }
  0x10   :  { %142 = vmatpush.bf16.msra.mxu1 %v255_v8 }
  0x14   :  { %143 = vmatpush.bf16.msra.mxu1 %v254_v9 }
  0x18   :  { %144 = vmatpush.bf16.msra.mxu1 %v253_v10 }
  0x1c   :  { %145 = vmatpush.bf16.msra.mxu1 %v252_v11 }
  0x20   :  { %146 = vmatpush.bf16.msra.mxu1 %v251_v12 }
  0x7c   :  { %v158_v27 = vpop.permute.xlu0 %157 }
  0x7d   :  { %v160_v28 = vperm.slane %v158_v27, 0 }
  0x88   :  { %v65_v14 = vpop.f32.mrf.mxu0 }
  0x89   :  { %v66_v15 = vadd.f32 %v262_v13, %v65_v14 }
  0x8b   :  { %v69_v16 = vmax.f32 %v66_v15, 0.0 }
  0x8d   :  { %v70_v17 = vpack.c.bf16 %v69_v16, %v69_v16 }
  0x8f   :  { %147 = vmatmul.bf16.vlgmr.msra.gmra.mxu1 %v70_v17 }
  0x90   :  { %v67_v18 = vpop.f32.mrf.mxu0 }
 0x10c   :  { %v148_v22 = vpop.f32.mrf.mxu1 }
 0x10d   :  { %v149_v23 = vadd.f32 %v263_v21, %v148_v22 }
 0x10f   :  { %v152_v24 = vmax.f32 %v149_v23, 0.0 }
 0x111   :  { %247 = vmatpush.xpose.msk.msra.mxu2 %vm161_vm1, %v152_v24 }
 0x114   :  { %v150_v26 = vpop.f32.mrf.mxu1  ;;  %248 = vmatmul.msk.f32.vlgmr.msra.gmra.mxu2 %vm161_vm1, %v153_v25 }
 0x197   :  { %v185_v29 = vpop.f32.mrf.mxu2 }
 0x198   :  { %v186_v30 = vadd.f32 %v185_v29, %v160_v28 }
 0x19a   :  { %189 = vst.msk [vmem:[#allocation3] sm:$0x1] %vm188_vm2, %v186_v30 }
 0x19b   :  { %200 = dma.vmem_to_hbm [thread:$0]  %s196_s27, 16, %s198_s30, [#allocation4]  }
 0x19c   :  { %288 = dma.done.wait [#allocation4], 16  }
 0x19d   :  { %289 = vsyncadd [#allocation4], 4294967280 }
 0x19e   :  { %205 = vsyncpa [#allocation4], 1 }

</bundles_post_ra>
